<compile_context>
chip_gen: v7x
topology: tpu7x:2x2x1
jax: 0.10.0
libtpu: 0.0.40
codegen_flags: <defaults>
</compile_context>

<pallas_src>
import jax
import jax.numpy as jnp
from jax.experimental import pallas as pl
from jax.experimental.pallas import tpu as pltpu
from typing import NamedTuple

PERIODIC_TABLE = ['Dummy'] + (
    "H He Li Be B C N O F Ne Na Mg Al Si P S Cl Ar K Ca "
    "Sc Ti V Cr Mn Fe Co Ni Cu Zn Ga Ge As Se Br Kr Rb Sr Y Zr "
    "Nb Mo Tc Ru Rh Pd Ag Cd In Sn Sb Te I Xe Cs Ba La Ce Pr Nd "
    "Pm Sm Eu Gd Tb Dy Ho Er Tm Yb Lu Hf Ta W Re Os Ir Pt Au Hg "
    "Tl Pb Bi Po At Rn Fr Ra Ac Th Pa U Np Pu Am Cm Bk Cf Es Fm "
    "Md No Lr Rf Db Sg Bh Hs Mt Ds Rg Cn Nh Fl Mc Lv Ts Og"
).split()

LANE = 128                   # lane width; species tiles are (block_rows, 128)
_DEFAULT_BLOCK_ROWS = 4096   # 2 MiB species tile; in+out double-buffered = 8 MiB VMEM


class SpeciesCoordinates(NamedTuple):
    species: jax.Array
    coordinates: jax.Array


def _round_up(x, m):
    return ((x + m - 1) // m) * m


def build_species_pairs(species_order):
    """Static (atomic_number -> internal_index) pairs; mirrors SpeciesConverter.__init__."""
    rev_idx = {s: k for k, s in enumerate(PERIODIC_TABLE)}
    return tuple((rev_idx[s], i) for i, s in enumerate(species_order))


# ----------------------------------------------------------------------------- kernel

def make_convert_kernel(pairs):
    """Compile-time unrolled compare/select chain baked in as constants (pure VPU)."""
    def kernel(species_ref, out_ref):
        sp = species_ref[...]                         # (br, 128) int32
        out = jnp.full_like(sp, -1)                   # padding & unknown species -> -1
        for z, idx in pairs:                          # <= len(species_order) selects
            out = jnp.where(sp == z, jnp.int32(idx), out)
        out_ref[...] = out
    return kernel


# ------------------------------------------------------------------------ pallas driver

def _pallas_convert(pairs, sp2d, block_rows):
    rows = sp2d.shape[0]
    num_blocks = pl.cdiv(rows, block_rows)            # ragged last block is masked
    return pl.pallas_call(
        make_convert_kernel(pairs),
        out_shape=jax.ShapeDtypeStruct((rows, LANE), jnp.int32),
        grid=(num_blocks,),
        in_specs=[pl.BlockSpec((block_rows, LANE), lambda i: (i, 0))],
        out_specs=pl.BlockSpec((block_rows, LANE), lambda i: (i, 0)),
        compiler_params=pltpu.CompilerParams(dimension_semantics=("parallel",)),
    )(sp2d)


def species_converter_forward(pairs, species, coordinates, *,
                              block_rows=None, validate=False):
    """Pallas-backed SpeciesConverter.forward((species, coordinates))."""
    B, A = species.shape
    total = B * A

    # Lane-dense layout: (rows, 128) with rows a multiple of 8 (tiny <4 KiB tail pad).
    rows = _round_up(max(1, pl.cdiv(total, LANE)), 8)

    if block_rows is None:
        br = _DEFAULT_BLOCK_ROWS
        # Give the 'parallel' axis >=2 blocks when there's enough work, so both
        # v7x TensorCores participate (one extra ~0.35us step on single-TC chips).
        if rows > 16 and pl.cdiv(rows, br) < 2:
            br = _round_up(pl.cdiv(rows, 2), 8)
    else:
        br = block_rows
    br = max(8, _round_up(br, 8))
    br = min(br, rows)

    flat = species.reshape(-1).astype(jnp.int32)
    pad = rows * LANE - total
    if pad:
        # Only the ragged tail (< 8*128 ints) is padded; aligned inputs skip this copy.
        flat = jnp.pad(flat, (0, pad), constant_values=-1)
    sp2d = flat.reshape(rows, LANE)

    conv2d = _pallas_convert(pairs, sp2d, br)
    if pad:
        converted = conv2d.reshape(-1)[:total].reshape(B, A)
    else:
        converted = conv2d.reshape(B, A)

    if validate:
        bad = jnp.any((species != -1) & (converted < 0))
        try:
            if bool(bad):
                raise ValueError(f"Unknown species found in {species}")
        except jax.errors.ConcretizationTypeError:
            # TODO(synk): under jit, surface this via jax.experimental.checkify
            # instead of a host-side raise (a traced flag cannot be read here).
            pass

    return SpeciesCoordinates(species=converted, coordinates=coordinates)


# ------------------------------------------------------------------------------- main

if __name__ == "__main__":
    # Converter ordered like torchani's ANI models: ['H', 'C', 'N', 'O']
    pairs = build_species_pairs(['H', 'C', 'N', 'O'])

    # Pure-JAX reference lookup table (256 entries, -1 fill).
    ref_table = jnp.full((256,), -1, dtype=jnp.int32)
    for z, idx in pairs:
        ref_table = ref_table.at[z].set(idx)

    def reference(species):
        looked = ref_table[jnp.clip(species, 0, 255)]
        return jnp.where(species < 0, jnp.int32(-1), looked)

    key = jax.random.PRNGKey(0)
    k_sp, k_xyz, k_sp2 = jax.random.split(key, 3)

    # Small ANI-like batch: 2 molecules x 8 atoms (last two atoms are -1 padding).
    B, A = 2, 8
    atomic_choices = jnp.array([1, 6, 7, 8], dtype=jnp.int32)     # H, C, N, O
    species = atomic_choices[jax.random.randint(k_sp, (B, A), 0, 4)]
    species = species.at[:, -2:].set(-1)
    coordinates = jax.random.normal(k_xyz, (B, A, 3), dtype=jnp.float32)

    out = species_converter_forward(pairs, species, coordinates)
    converted = jax.block_until_ready(out.species)
    coords_out = jax.block_until_ready(out.coordinates)

    assert converted.shape == (B, A) and converted.dtype == jnp.int32
    assert bool(jnp.all(converted == reference(species)))
    assert bool(jnp.all(coords_out == coordinates))

    # Multi-tile path (grid > 1, ragged-free, also under jit): 16 x 128 atoms,
    # 8-row blocks -> 2 grid steps.
    B2, A2 = 16, 128
    species2 = atomic_choices[jax.random.randint(k_sp2, (B2, A2), 0, 4)]
    coords2 = jnp.zeros((B2, A2, 3), dtype=jnp.float32)

    import functools
    fwd_jit = jax.jit(functools.partial(species_converter_forward, pairs, block_rows=8))
    out2 = fwd_jit(species2, coords2)
    assert bool(jnp.all(jax.block_until_ready(out2.species) == reference(species2)))

    # Unknown (He=2) and out-of-range (200) species map to -1 (never silently to
    # index 0) and are flagged when validation is requested outside of jit.
    bad_species = species.at[0, 0].set(2).at[1, 0].set(200)
    bad_out = species_converter_forward(pairs, bad_species, coordinates)
    assert int(bad_out.species[0, 0]) == -1 and int(bad_out.species[1, 0]) == -1
    try:
        species_converter_forward(pairs, bad_species, coordinates, validate=True)
        raise AssertionError("expected ValueError for unknown species")
    except ValueError:
        pass

    print("KERNEL_OK")
</pallas_src>

<mosaic_0001>
module attributes {stable_mosaic.version = 11 : i64} {
  func.func @kernel(%arg0: i32, %arg1: memref<8x128xi32, #tpu.memory_space<vmem>>, %arg2: memref<8x128xi32, #tpu.memory_space<vmem>>) attributes {dimension_semantics = [#tpu.dimension_semantics<parallel>], iteration_bounds = array<i64: 1>, scalar_prefetch = 0 : i64, scratch_operands = 0 : i64, tpu.core_type = #tpu.core_type<tc>, window_params = [{transform_indices = @transform_0, window_bounds = array<i64: 8, 128>}, {transform_indices = @transform_1, window_bounds = array<i64: 8, 128>}]} {
    %c0 = arith.constant 0 : index
    %c0_0 = arith.constant 0 : index
    %0 = vector.load %arg1[%c0, %c0_0] : memref<8x128xi32, #tpu.memory_space<vmem>>, vector<8x128xi32>
    %c-1_i32 = arith.constant -1 : i32
    %1 = vector.broadcast %c-1_i32 : i32 to vector<8x128xi32>
    %c1_i32 = arith.constant 1 : i32
    %2 = vector.broadcast %c1_i32 : i32 to vector<8x128xi32>
    %3 = arith.cmpi eq, %0, %2 : vector<8x128xi32>
    %c0_i32 = arith.constant 0 : i32
    %4 = vector.broadcast %c0_i32 : i32 to vector<8x128xi32>
    %5 = arith.select %3, %4, %1 : vector<8x128xi1>, vector<8x128xi32>
    %c6_i32 = arith.constant 6 : i32
    %6 = vector.broadcast %c6_i32 : i32 to vector<8x128xi32>
    %7 = arith.cmpi eq, %0, %6 : vector<8x128xi32>
    %c1_i32_1 = arith.constant 1 : i32
    %8 = vector.broadcast %c1_i32_1 : i32 to vector<8x128xi32>
    %9 = arith.select %7, %8, %5 : vector<8x128xi1>, vector<8x128xi32>
    %c7_i32 = arith.constant 7 : i32
    %10 = vector.broadcast %c7_i32 : i32 to vector<8x128xi32>
    %11 = arith.cmpi eq, %0, %10 : vector<8x128xi32>
    %c2_i32 = arith.constant 2 : i32
    %12 = vector.broadcast %c2_i32 : i32 to vector<8x128xi32>
    %13 = arith.select %11, %12, %9 : vector<8x128xi1>, vector<8x128xi32>
    %c8_i32 = arith.constant 8 : i32
    %14 = vector.broadcast %c8_i32 : i32 to vector<8x128xi32>
    %15 = arith.cmpi eq, %0, %14 : vector<8x128xi32>
    %c3_i32 = arith.constant 3 : i32
    %16 = vector.broadcast %c3_i32 : i32 to vector<8x128xi32>
    %17 = arith.select %15, %16, %13 : vector<8x128xi1>, vector<8x128xi32>
    %c0_2 = arith.constant 0 : index
    %c0_3 = arith.constant 0 : index
    %18 = vector.load %arg2[%c0_2, %c0_3] : memref<8x128xi32, #tpu.memory_space<vmem>>, vector<8x128xi32>
    tpu.vector_store %arg2[%c0_2, %c0_3], %17 {strides = array<i32>} : memref<8x128xi32, #tpu.memory_space<vmem>>, vector<8x128xi32>,
    return
  }
  func.func @transform_0(%arg0: i32) -> (i32, i32) {
    %c0_i32 = arith.constant 0 : i32
    %c0_i32_0 = arith.constant 0 : i32
    return %arg0, %c0_i32 : i32, i32
  }
  func.func @transform_1(%arg0: i32) -> (i32, i32) {
    %c0_i32 = arith.constant 0 : i32
    %c0_i32_0 = arith.constant 0 : i32
    return %arg0, %c0_i32 : i32, i32
  }
}

</mosaic_0001>

<bundles_post_ra>
// kernel: tpu_custom_call.1
= control target key start
LH: loop header
LB: loop body
LE: loop exit
PB: predicated region body
PF: predicated region fallthrough
CT: control target
= control target key end

     0   :  { %6 = vsyncpa [#allocation3], 0  ;;  %s134_s0 = inlined_call_operand.hbm [shape: s32[8,128], index: 0, kind: input, shape index: {}]   ;;  %s135_s1 = inlined_call_operand.hbm [shape: s32[8,128], index: 1, kind: output, shape index: {}]  }
   0x1   :  { %7 = vsyncpa [#allocation4], 0  ;;  %s97_s6 = smov [#allocation2]   ;;  %s49_s10 = scalar_lea.hbm %s134_s0, 128 }
   0x2   :  { %s14_s7 = sshll.u32 %s97_s6, 4  ;;  %p50_p0 = scmp.ne.s32.totalorder %s134_s0, %s49_s10  ;;  %s15_s7 = int_to_ptr.vmem [resolvable:$true] %s14_s7 }
   0x3   :  { %p53_p1 = scmp.lt.u32.totalorder %s49_s10, %s134_s0 }
   0x5   :  { %p55_p2 = pnand %p53_p1, %p50_p0 }
   0x7   :  { %58 = shalt.err (!%p55_p2)
}
   0x8   :  { %s59_s15 = scalar_lea.vmem %s15_s7, 128  ;;  %p64_p4 = scmp.lt.s32.totalorder %s15_s7, %s15_s7 }
   0x9   :  { %p60_p3 = scmp.ne.s32.totalorder %s15_s7, %s59_s15  ;;  %p65_p5 = scmp.lt.s32.totalorder %s59_s15, %s59_s15 }
   0xb   :  { %p66_p6 = por %p65_p5, %p64_p4 }
   0xd   :  { %p67_p7 = pnand %p66_p6, %p60_p3 }
   0xf   :  { %70 = shalt.err (!%p67_p7)
}
  0x10   :  { %17 = dma.hbm_to_vmem [thread:$0]  %s134_s0, 128, %s15_s7, [#allocation3]  }
  0x11   :  { %93 = dma.done.wait [#allocation3], 128  }
  0x12   :  { %94 = vsyncadd [#allocation3], 4294967168  ;;  %v21_v0 = vld [vmem:[#allocation2] sm:$0xff]  ;;  %s98_s18 = smov [#allocation5]   ;;  %v99_v1 = vmov 4294967295  }
  0x13   :  { %vm22_vm0 = vcmp.eq.s32.totalorder %v21_v0, 1  ;;  %vm24_vm1 = vcmp.eq.s32.totalorder %v21_v0, 6  ;;  %vm26_vm2 = vcmp.eq.s32.totalorder %v21_v0, 7  ;;  %s37_s19 = sshll.u32 %s98_s18, 4  ;;  %vm28_vm3 = vcmp.eq.s32.totalorder %v21_v0, 8  ;;  %s38_s19 = int_to_ptr.vmem [resolvable:$true] %s37_s19 }
  0x14   :  { %v23_v2 = vsel %vm22_vm0, 0, %v99_v1  ;;  %s71_s20 = scalar_lea.vmem %s38_s19, 128  ;;  %p76_p9 = scmp.lt.s32.totalorder %s38_s19, %s38_s19 }
  0x15   :  { %v25_v3 = vsel %vm24_vm1, 1, %v23_v2  ;;  %p72_p8 = scmp.ne.s32.totalorder %s38_s19, %s71_s20  ;;  %p77_p10 = scmp.lt.s32.totalorder %s71_s20, %s71_s20 }
  0x16   :  { %v27_v4 = vsel %vm26_vm2, 2, %v25_v3 }
  0x17   :  { %v29_v5 = vsel %vm28_vm3, 3, %v27_v4  ;;  %p78_p11 = por %p77_p10, %p76_p9 }
  0x18   :  { %30 = vst [vmem:[#allocation5] sm:$0xff] %v29_v5 }
  0x19   :  { %p79_p12 = pnand %p78_p11, %p72_p8 }
  0x1b   :  { %82 = shalt.err (!%p79_p12)
}
  0x1c   :  { %s83_s22 = scalar_lea.hbm %s135_s1, 128 }
  0x1d   :  { %p84_p13 = scmp.ne.s32.totalorder %s135_s1, %s83_s22  ;;  %p87_p0 = scmp.lt.u32.totalorder %s83_s22, %s135_s1 }
  0x1f   :  { %p89_p1 = pnand %p87_p0, %p84_p13 }
  0x21   :  { %92 = shalt.err (!%p89_p1)
}
  0x22   :  { %40 = dma.vmem_to_hbm [thread:$0]  %s38_s19, 128, %s135_s1, [#allocation4]  }
  0x23   :  { %95 = dma.done.wait [#allocation4], 128  }
  0x24   :  { %96 = vsyncadd [#allocation4], 4294967168 }
  0x25   :  { %44 = vsyncpa [#allocation3], 1 }
  0x26   :  { %45 = vsyncpa [#allocation4], 1 }

</bundles_post_ra>
